<compile_context>
chip_gen: v7x
topology: tpu7x:2x2x1
jax: 0.10.0
libtpu: 0.0.40
codegen_flags: <defaults>
</compile_context>

<pallas_src>
import functools

import jax
import jax.numpy as jnp
from jax import lax
from jax.experimental import pallas as pl
from jax.experimental.pallas import tpu as pltpu


_VMEM_LIMIT_BYTES = 48 * 1024 * 1024       # safe on v5e/v6e, under v7x's 64 MiB
_RESIDENT_BUDGET_BYTES = 40 * 1024 * 1024  # use resident-code layout below this


def _round_up(x, m):
    return ((x + m - 1) // m) * m


def _sublane(dtype):
    # Sub-32-bit dtypes pack along sublanes: keep row tiles a multiple of 16.
    return 16 if jnp.dtype(dtype).itemsize < 4 else 8


# ----------------------------------------------------------------------------
# Resident-code kernel: 1-D grid over nl row tiles, full code matrix in VMEM.
# ----------------------------------------------------------------------------
def _nce_resident_kernel(nl_ref, code_ref, out_ref, *, n, tm):
    i = pl.program_id(0)
    cols_pad = code_ref.shape[0]

    # Native-dtype operands straight into the MXU; f32 accumulation.
    s = lax.dot_general(nl_ref[...], code_ref[...],
                        (((1,), (1,)), ((), ())),
                        preferred_element_type=jnp.float32)      # (tm, cols_pad)

    row_ids = i * tm + lax.broadcasted_iota(jnp.int32, (tm, 1), 0)   # (tm, 1)
    col_ids = lax.broadcasted_iota(jnp.int32, (1, cols_pad), 1)      # (1, cols_pad)

    # Positive (diagonal) logits from the raw scores (targets = arange(N));
    # taken before the -inf masking so padded rows stay NaN/inf free.
    diag = jnp.sum(jnp.where(row_ids == col_ids, s, 0.0),
                   axis=1, keepdims=True)                            # (tm, 1)

    if cols_pad > n:  # static: only mask when padded columns actually exist
        s = jnp.where(col_ids < n, s, -jnp.inf)

    m = jnp.max(s, axis=1, keepdims=True)
    l = jnp.sum(jnp.exp(s - m), axis=1, keepdims=True)
    row_loss = m + jnp.log(l) - diag                                 # (tm, 1)
    row_loss = jnp.where(row_ids < n, row_loss, 0.0)

    # Lane-dense (tm, 128) partial-loss block: per-row loss in lane 0.
    lane = lax.broadcasted_iota(jnp.int32, (tm, 128), 1)
    out_ref[...] = jnp.where(lane == 0, row_loss, 0.0)


# ----------------------------------------------------------------------------
# Streaming fallback: 2-D grid (row tiles x column tiles), online logsumexp.
# ----------------------------------------------------------------------------
def _nce_streaming_kernel(nl_ref, code_ref, out_ref, m_sc, l_sc, diag_sc, *,
                          n, tm, tn, mask_cols):
    i = pl.program_id(0)          # nl row tile
    j = pl.program_id(1)          # code column tile (reduction axis, last)
    nj = pl.num_programs(1)

    @pl.when(j == 0)
    def _init():
        m_sc[...] = jnp.full_like(m_sc, -jnp.inf)
        l_sc[...] = jnp.zeros_like(l_sc)
        diag_sc[...] = jnp.zeros_like(diag_sc)
        out_ref[...] = jnp.zeros_like(out_ref)

    # Native-dtype tiles straight into the MXU; f32 accumulation.
    s = lax.dot_general(nl_ref[...], code_ref[...],
                        (((1,), (1,)), ((), ())),
                        preferred_element_type=jnp.float32)      # (tm, tn)

    row_start = i * tm
    col_start = j * tn

    # Diagonal logits only on the column tile whose range overlaps this row
    # tile's range (general condition; equals i == j when tm == tn).
    overlaps = jnp.logical_and(row_start < col_start + tn,
                               col_start < row_start + tm)

    @pl.when(overlaps)
    def _diag():
        row_ids = row_start + lax.broadcasted_iota(jnp.int32, (tm, 1), 0)
        col_ids = col_start + lax.broadcasted_iota(jnp.int32, (1, tn), 1)
        diag_sc[...] += jnp.sum(jnp.where(row_ids == col_ids, s, 0.0),
                                axis=1, keepdims=True)

    if mask_cols:  # static: padded columns exist only when cols_pad > n
        col_ids = col_start + lax.broadcasted_iota(jnp.int32, (1, tn), 1)
        s = jnp.where(col_ids < n, s, -jnp.inf)

    # Online logsumexp across column tiles.
    m_prev = m_sc[...]
    m_new = jnp.maximum(m_prev, jnp.max(s, axis=1, keepdims=True))
    l_sc[...] = l_sc[...] * jnp.exp(m_prev - m_new) + jnp.sum(
        jnp.exp(s - m_new), axis=1, keepdims=True)
    m_sc[...] = m_new

    @pl.when(j == nj - 1)
    def _finalize():
        row_ids = row_start + lax.broadcasted_iota(jnp.int32, (tm, 1), 0)
        row_loss = m_sc[...] + jnp.log(l_sc[...]) - diag_sc[...]
        row_loss = jnp.where(row_ids < n, row_loss, 0.0)
        lane = lax.broadcasted_iota(jnp.int32, (tm, 128), 1)
        out_ref[...] = jnp.where(lane == 0, row_loss, 0.0)


# ----------------------------------------------------------------------------
# Wrappers
# ----------------------------------------------------------------------------
def _resident_call(nl_vec, code_vec, *, tm):
    n, d = nl_vec.shape
    sub = _sublane(nl_vec.dtype)
    tm = min(_round_up(tm, sub), _round_up(n, sub))
    rows_pad = _round_up(n, tm)
    cols_pad = _round_up(n, 128)

    nl_p = nl_vec if rows_pad == n else jnp.pad(nl_vec, ((0, rows_pad - n), (0, 0)))
    code_p = code_vec if cols_pad == n else jnp.pad(code_vec, ((0, cols_pad - n), (0, 0)))

    kernel = functools.partial(_nce_resident_kernel, n=n, tm=tm)
    out = pl.pallas_call(
        kernel,
        out_shape=jax.ShapeDtypeStruct((rows_pad, 128), jnp.float32),
        grid_spec=pltpu.PrefetchScalarGridSpec(
            num_scalar_prefetch=0,
            grid=(rows_pad // tm,),
            in_specs=[
                pl.BlockSpec((tm, d), lambda i: (i, 0)),         # nl row tile
                pl.BlockSpec((cols_pad, d), lambda i: (0, 0)),   # resident code
            ],
            out_specs=pl.BlockSpec((tm, 128), lambda i: (i, 0)),
        ),
        compiler_params=pltpu.CompilerParams(
            dimension_semantics=("parallel",),
            vmem_limit_bytes=_VMEM_LIMIT_BYTES),
    )(nl_p, code_p)
    return jnp.sum(out) * (1.0 / n)   # CrossEntropyLoss reduction='mean'


def _streaming_call(nl_vec, code_vec, *, tm, tn):
    n, d = nl_vec.shape
    sub = _sublane(nl_vec.dtype)
    tm = min(_round_up(tm, sub), _round_up(n, sub))
    tn = min(_round_up(tn, 128), _round_up(n, 128))
    rows_pad = _round_up(n, tm)
    cols_pad = _round_up(n, tn)

    nl_p = nl_vec if rows_pad == n else jnp.pad(nl_vec, ((0, rows_pad - n), (0, 0)))
    code_p = code_vec if cols_pad == n else jnp.pad(code_vec, ((0, cols_pad - n), (0, 0)))

    kernel = functools.partial(_nce_streaming_kernel, n=n, tm=tm, tn=tn,
                               mask_cols=cols_pad > n)
    out = pl.pallas_call(
        kernel,
        out_shape=jax.ShapeDtypeStruct((rows_pad, 128), jnp.float32),
        grid_spec=pltpu.PrefetchScalarGridSpec(
            num_scalar_prefetch=0,
            grid=(rows_pad // tm, cols_pad // tn),
            in_specs=[
                pl.BlockSpec((tm, d), lambda i, j: (i, 0)),   # nl row tile
                pl.BlockSpec((tn, d), lambda i, j: (j, 0)),   # streamed code tile
            ],
            out_specs=pl.BlockSpec((tm, 128), lambda i, j: (i, 0)),
            scratch_shapes=[
                pltpu.VMEM((tm, 1), jnp.float32),   # running row max
                pltpu.VMEM((tm, 1), jnp.float32),   # running sum of exp
                pltpu.VMEM((tm, 1), jnp.float32),   # diagonal logits
            ],
        ),
        compiler_params=pltpu.CompilerParams(
            dimension_semantics=("parallel", "arbitrary"),
            vmem_limit_bytes=_VMEM_LIMIT_BYTES),
    )(nl_p, code_p)
    return jnp.sum(out) * (1.0 / n)


def nce_loss_pallas(nl_vec, code_vec, *, tm=256, tn=256, force_streaming=False):
    """Fused `scores = nl @ code.T` + softmax-cross-entropy(arange(N)) mean loss."""
    n, d = nl_vec.shape
    assert code_vec.shape == (n, d), "nl_vec and code_vec must both be (N, D)"

    sub = _sublane(nl_vec.dtype)
    tm_eff = min(_round_up(tm, sub), _round_up(n, sub))
    cols_pad = _round_up(n, 128)
    code_item = jnp.dtype(code_vec.dtype).itemsize
    nl_item = jnp.dtype(nl_vec.dtype).itemsize
    resident_bytes = (2 * cols_pad * d * code_item        # resident code (2 buffers)
                      + 2 * tm_eff * d * nl_item          # double-buffered nl tile
                      + 2 * tm_eff * 128 * 4              # output blocks
                      + 3 * tm_eff * cols_pad * 4)        # f32 score-strip temporaries

    if force_streaming or resident_bytes > _RESIDENT_BUDGET_BYTES:
        return _streaming_call(nl_vec, code_vec, tm=tm, tn=tn)
    return _resident_call(nl_vec, code_vec, tm=tm)


def graphcodebert_forward(nl_vec, code_vec, *, tm=256, tn=256):
    """Mirrors ModelGraphCodeBERTOriginal.forward given the pooled embeddings.

    # TODO(synk): the GraphCodeBERT encoder (self.encoder, a pretrained
    # RoBERTa-style transformer) is not re-implemented here; this consumes the
    # pooled nl_vec / code_vec embeddings it would produce.
    """
    nce_loss = nce_loss_pallas(nl_vec, code_vec, tm=tm, tn=tn)
    ce_loss = jnp.zeros((1,), jnp.float32)
    loss_dict = {'all': nce_loss + ce_loss, 'ce_loss': ce_loss,
                 'nce_loss': nce_loss}
    return loss_dict, jnp.zeros((1,), jnp.float32)


def _reference_nce(nl_vec, code_vec):
    """Pure-JAX reference mirroring the PyTorch forward, for verification."""
    scores = jnp.einsum('ab,cb->ac', nl_vec.astype(jnp.float32),
                        code_vec.astype(jnp.float32))
    log_probs = jax.nn.log_softmax(scores, axis=-1)
    return -jnp.mean(jnp.diagonal(log_probs))


if __name__ == "__main__":
    # Small contrastive batch: N nl/code pairs, hidden size D. N=160 is chosen
    # so padding, the multi-column-tile streaming path, and the resident path
    # are all exercised.
    N, D = 160, 128
    key = jax.random.PRNGKey(0)
    k1, k2 = jax.random.split(key)
    nl_vec = jax.random.normal(k1, (N, D), dtype=jnp.float32)
    code_vec = jax.random.normal(k2, (N, D), dtype=jnp.float32)

    ref = jax.block_until_ready(_reference_nce(nl_vec, code_vec))

    # 1) Default path: resident-code layout, 1-D parallel row grid.
    loss_dict, aux = graphcodebert_forward(nl_vec, code_vec)
    loss_dict = jax.block_until_ready(loss_dict)
    aux = jax.block_until_ready(aux)
    assert jnp.allclose(loss_dict['nce_loss'], ref, rtol=2e-4, atol=2e-4), (
        loss_dict['nce_loss'], ref)
    assert jnp.allclose(loss_dict['all'][0], ref, rtol=2e-4, atol=2e-4), (
        loss_dict['all'], ref)
    assert jnp.allclose(loss_dict['ce_loss'], 0.0)

    # 2) Streaming fallback (forced): online logsumexp over 2 column tiles,
    #    gated diagonal extraction, padded rows and columns.
    nce_stream = jax.block_until_ready(
        nce_loss_pallas(nl_vec, code_vec, tm=64, tn=128, force_streaming=True))
    assert jnp.allclose(nce_stream, ref, rtol=2e-4, atol=2e-4), (nce_stream, ref)

    # 3) bf16 inputs: MXU bf16-in / f32-accumulate fast path (no upcast).
    nl_bf = nl_vec.astype(jnp.bfloat16)
    code_bf = code_vec.astype(jnp.bfloat16)
    ref_bf = jax.block_until_ready(_reference_nce(nl_bf, code_bf))
    nce_bf = jax.block_until_ready(nce_loss_pallas(nl_bf, code_bf))
    assert jnp.allclose(nce_bf, ref_bf, rtol=1e-2, atol=1e-2), (nce_bf, ref_bf)

    print("KERNEL_OK")
</pallas_src>

<mosaic_0001>
module attributes {stable_mosaic.version = 11 : i64} {
  func.func @_nce_resident_kernel(%arg0: i32, %arg1: memref<160x128xf32, #tpu.memory_space<vmem>>, %arg2: memref<256x128xf32, #tpu.memory_space<vmem>>, %arg3: memref<160x128xf32, #tpu.memory_space<vmem>>) attributes {dimension_semantics = [#tpu.dimension_semantics<parallel>], iteration_bounds = array<i64: 1>, scalar_prefetch = 0 : i64, scratch_operands = 0 : i64, tpu.core_type = #tpu.core_type<tc>, window_params = [{transform_indices = @transform_0, window_bounds = array<i64: 160, 128>}, {pipeline_mode = #tpu.pipeline_mode<synchronous>, transform_indices = @transform_1, window_bounds = array<i64: 256, 128>}, {transform_indices = @transform_2, window_bounds = array<i64: 160, 128>}]} {
    %c0 = arith.constant 0 : index
    %c0_0 = arith.constant 0 : index
    %0 = vector.load %arg1[%c0, %c0_0] : memref<160x128xf32, #tpu.memory_space<vmem>>, vector<160x128xf32>
    %c0_1 = arith.constant 0 : index
    %c0_2 = arith.constant 0 : index
    %1 = vector.load %arg2[%c0_1, %c0_2] : memref<256x128xf32, #tpu.memory_space<vmem>>, vector<256x128xf32>
    %cst = arith.constant dense<0.000000e+00> : vector<160x256xf32>
    %2 = tpu.matmul %0, %1, %cst {dimension_numbers = #tpu.dot_dimension_numbers<[1], [1], [0], [0], [0, 0, 1, 0], [], []>} : vector<160x128xf32>, vector<256x128xf32>, vector<160x256xf32> -> vector<160x256xf32>
    %c160_i32 = arith.constant 160 : i32
    %3 = arith.muli %arg0, %c160_i32 : i32
    %4 = tpu.iota {dimensions = array<i32: 0>} : vector<160x1xi32>
    %5 = vector.broadcast %3 : i32 to vector<160x1xi32>
    %6 = arith.addi %5, %4 : vector<160x1xi32>
    %7 = tpu.iota {dimensions = array<i32: 1>} : vector<1x256xi32>
    %8 = vector.broadcast %6 : vector<160x1xi32> to vector<160x256xi32>
    %9 = vector.broadcast %7 : vector<1x256xi32> to vector<160x256xi32>
    %10 = arith.cmpi eq, %8, %9 : vector<160x256xi32>
    %cst_3 = arith.constant 0.000000e+00 : f32
    %11 = vector.broadcast %cst_3 : f32 to vector<160x256xf32>
    %12 = arith.select %10, %2, %11 : vector<160x256xi1>, vector<160x256xf32>
    %cst_4 = arith.constant dense<0.000000e+00> : vector<160xf32>
    %13 = vector.multi_reduction <add>, %12, %cst_4 [1] : vector<160x256xf32> to vector<160xf32>
    %14 = vector.shape_cast %13 : vector<160xf32> to vector<160x1xf32>
    %c160_i32_5 = arith.constant 160 : i32
    %15 = vector.broadcast %c160_i32_5 : i32 to vector<1x256xi32>
    %16 = arith.cmpi slt, %7, %15 : vector<1x256xi32>
    %cst_6 = arith.constant 0xFF800000 : f32
    %17 = vector.shape_cast %16 : vector<1x256xi1> to vector<1x256xi1>
    %18 = vector.broadcast %17 : vector<1x256xi1> to vector<160x256xi1>
    %19 = vector.broadcast %cst_6 : f32 to vector<160x256xf32>
    %20 = arith.select %18, %2, %19 : vector<160x256xi1>, vector<160x256xf32>
    %cst_7 = arith.constant dense<0xFF800000> : vector<160xf32>
    %21 = vector.multi_reduction <maximumf>, %20, %cst_7 [1] : vector<160x256xf32> to vector<160xf32>
    %22 = vector.shape_cast %21 : vector<160xf32> to vector<160x1xf32>
    %23 = vector.broadcast %22 : vector<160x1xf32> to vector<160x256xf32>
    %24 = arith.subf %20, %23 : vector<160x256xf32>
    %25 = math.exp %24 : vector<160x256xf32>
    %cst_8 = arith.constant dense<0.000000e+00> : vector<160xf32>
    %26 = vector.multi_reduction <add>, %25, %cst_8 [1] : vector<160x256xf32> to vector<160xf32>
    %27 = vector.shape_cast %26 : vector<160xf32> to vector<160x1xf32>
    %28 = math.log %27 : vector<160x1xf32>
    %29 = arith.addf %22, %28 : vector<160x1xf32>
    %30 = arith.subf %29, %14 : vector<160x1xf32>
    %c160_i32_9 = arith.constant 160 : i32
    %31 = vector.broadcast %c160_i32_9 : i32 to vector<160x1xi32>
    %32 = arith.cmpi slt, %6, %31 : vector<160x1xi32>
    %cst_10 = arith.constant 0.000000e+00 : f32
    %33 = vector.broadcast %cst_10 : f32 to vector<160x1xf32>
    %34 = arith.select %32, %30, %33 : vector<160x1xi1>, vector<160x1xf32>
    %35 = tpu.iota {dimensions = array<i32: 1>} : vector<160x128xi32>
    %c0_i32 = arith.constant 0 : i32
    %36 = vector.broadcast %c0_i32 : i32 to vector<160x128xi32>
    %37 = arith.cmpi eq, %35, %36 : vector<160x128xi32>
    %cst_11 = arith.constant 0.000000e+00 : f32
    %38 = vector.shape_cast %34 : vector<160x1xf32> to vector<160x1xf32>
    %39 = vector.broadcast %38 : vector<160x1xf32> to vector<160x128xf32>
    %40 = vector.broadcast %cst_11 : f32 to vector<160x128xf32>
    %41 = arith.select %37, %39, %40 : vector<160x128xi1>, vector<160x128xf32>
    %c0_12 = arith.constant 0 : index
    %c0_13 = arith.constant 0 : index
    %42 = vector.load %arg3[%c0_12, %c0_13] : memref<160x128xf32, #tpu.memory_space<vmem>>, vector<160x128xf32>
    tpu.vector_store %arg3[%c0_12, %c0_13], %41 {strides = array<i32>} : memref<160x128xf32, #tpu.memory_space<vmem>>, vector<160x128xf32>,
    return
  }
  func.func @transform_0(%arg0: i32) -> (i32, i32) {
    %c0_i32 = arith.constant 0 : i32
    %c0_i32_0 = arith.constant 0 : i32
    return %arg0, %c0_i32 : i32, i32
  }
  func.func @transform_1(%arg0: i32) -> (i32, i32) {
    %c0_i32 = arith.constant 0 : i32
    %c0_i32_0 = arith.constant 0 : i32
    %c0_i32_1 = arith.constant 0 : i32
    return %c0_i32, %c0_i32_0 : i32, i32
  }
  func.func @transform_2(%arg0: i32) -> (i32, i32) {
    %c0_i32 = arith.constant 0 : i32
    %c0_i32_0 = arith.constant 0 : i32
    return %arg0, %c0_i32 : i32, i32
  }
}

</mosaic_0001>

<bundles_post_ra>
// kernel: tpu_custom_call.1
= control target key start
LH: loop header
LB: loop body
LE: loop exit
PB: predicated region body
PF: predicated region fallthrough
CT: control target
= control target key end

     0   :  { %7 = vsyncpa [#allocation3], 0  ;;  %s1792_s0 = inlined_call_operand.hbm [shape: f32[160,128], index: 0, kind: input, shape index: {}]   ;;  %s1793_s1 = inlined_call_operand.hbm [shape: f32[256,128], index: 1, kind: input, shape index: {}]   ;;  %s1794_s2 = inlined_call_operand.hbm [shape: f32[160,128], index: 2, kind: output, shape index: {}]  }
   0x1   :  { %8 = vsyncpa [#allocation6], 0 }
   0x2   :  { %9 = vsyncpa [#allocation4], 0  ;;  %s1245_s9 = smov [#allocation2]   ;;  %s1173_s13 = scalar_lea.hbm %s1792_s0, 2560 }
   0x3   :  { %s15_s10 = sshll.u32 %s1245_s9, 4  ;;  %p1174_p0 = scmp.ne.s32.totalorder %s1792_s0, %s1173_s13  ;;  %s16_s10 = int_to_ptr.vmem [resolvable:$true] %s15_s10 }
   0x4   :  { %p1177_p1 = scmp.lt.u32.totalorder %s1173_s13, %s1792_s0 }
   0x6   :  { %p1179_p2 = pnand %p1177_p1, %p1174_p0 }
   0x8   :  { %1182 = shalt.err (!%p1179_p2)
}
   0x9   :  { %s1183_s18 = scalar_lea.vmem %s16_s10, 2560  ;;  %p1188_p4 = scmp.lt.s32.totalorder %s16_s10, %s16_s10 }
   0xa   :  { %p1184_p3 = scmp.ne.s32.totalorder %s16_s10, %s1183_s18  ;;  %p1189_p5 = scmp.lt.s32.totalorder %s1183_s18, %s1183_s18 }
   0xc   :  { %p1190_p6 = por %p1189_p5, %p1188_p4 }
   0xe   :  { %p1191_p7 = pnand %p1190_p6, %p1184_p3 }
  0x10   :  { %1194 = shalt.err (!%p1191_p7)
}
  0x11   :  { %s1246_s19 = smov 128   ;;  %s1247_s20 = smov 8  }
  0x12   :  { %21 = dma.hbm_to_vmem [thread:$0]  %s1792_s0, 2560, %s16_s10, [#allocation3], %s1246_s19, %s1246_s19, %s1247_s20  }
  0x13   :  { %s1248_s23 = smov [#allocation5]   ;;  %s1195_s27 = scalar_lea.hbm %s1793_s1, 4096 }
  0x14   :  { %s27_s24 = sshll.u32 %s1248_s23, 4  ;;  %p1196_p8 = scmp.ne.s32.totalorder %s1793_s1, %s1195_s27  ;;  %s28_s24 = int_to_ptr.vmem [resolvable:$true] %s27_s24 }
  0x15   :  { %p1199_p9 = scmp.lt.u32.totalorder %s1195_s27, %s1793_s1 }
  0x17   :  { %p1201_p10 = pnand %p1199_p9, %p1196_p8 }
  0x19   :  { %1204 = shalt.err (!%p1201_p10)
}
  0x1a   :  { %s1205_s4 = scalar_lea.vmem %s28_s24, 4096  ;;  %p1210_p12 = scmp.lt.s32.totalorder %s28_s24, %s28_s24 }
  0x1b   :  { %p1206_p11 = scmp.ne.s32.totalorder %s28_s24, %s1205_s4  ;;  %p1211_p13 = scmp.lt.s32.totalorder %s1205_s4, %s1205_s4 }
  0x1d   :  { %p1212_p0 = por %p1211_p13, %p1210_p12 }
  0x1f   :  { %p1213_p1 = pnand %p1212_p0, %p1206_p11 }
  0x21   :  { %1216 = shalt.err (!%p1213_p1)
}
  0x22   :  { %33 = dma.hbm_to_vmem [thread:$0]  %s1793_s1, 4096, %s28_s24, [#allocation6], %s1246_s19, %s1246_s19, %s1247_s20  }
  0x23   :  { %1239 = dma.done.wait [#allocation3], 2560  }
  0x24   :  { %1240 = vsyncadd [#allocation3], 4294964736 }
  0x25   :  { %1241 = dma.done.wait [#allocation6], 4096  }
  0x26   :  { %1242 = vsyncadd [#allocation6], 4294963200  ;;  %v76_v0 = vld [vmem:[#allocation5 + $0x80] sm:$0xff]  ;;  %v77_v1 = vld [vmem:[#allocation5 + $0x88] sm:$0xff]  ;;  %s1249_s1 = smov [#allocation7]  }
  0x27   :  { %v60_v2 = vld [vmem:[#allocation5] sm:$0xff]  ;;  %v1000_v3 = vpack.c.bf16 %v77_v1, %v76_v0  ;;  %v61_v4 = vld [vmem:[#allocation5 + $0x8] sm:$0xff]  ;;  %v78_v5 = vld [vmem:[#allocation5 + $0x90] sm:$0xff]  ;;  %s915_s6 = sshll.u32 %s1249_s1, 4  ;;  %s916_s6 = int_to_ptr.vmem [resolvable:$true] %s915_s6 }
  0x28   :  { %v79_v6 = vld [vmem:[#allocation5 + $0x98] sm:$0xff]  ;;  %v1002_v7 = vpack.c.bf16 %v61_v4, %v60_v2  ;;  %v62_v9 = vld [vmem:[#allocation5 + $0x10] sm:$0xff]  ;;  %v80_v11 = vld [vmem:[#allocation5 + $0xa0] sm:$0xff]  ;;  %v278_v4 = vlaneseq  ;;  %s1217_s7 = scalar_lea.vmem %s916_s6, 2560  ;;  %p1222_p3 = scmp.lt.s32.totalorder %s916_s6, %s916_s6 }
  0x29   :  { %v1004_v8 = vpack.c.bf16 %v79_v6, %v78_v5  ;;  %1001 = vmatprep.subr.bf16.mxu0 %v1000_v3  ;;  %1032 = vmatprep.subr.bf16.mxu1 %v1000_v3  ;;  %v63_v10 = vld [vmem:[#allocation5 + $0x18] sm:$0xff]  ;;  %v81_v12 = vld [vmem:[#allocation5 + $0xa8] sm:$0xff]  ;;  %v1295_v15 = vld [vmem:[#allocation2] sm:$0xff]  ;;  %p1218_p2 = scmp.ne.s32.totalorder %s916_s6, %s1217_s7  ;;  %p1223_p4 = scmp.lt.s32.totalorder %s1217_s7, %s1217_s7 }
  0x2a   :  { %1003 = vmatpush3.bf16.xpose.msra.mxu0 %v1002_v7  ;;  %1040 = vmatpush3.bf16.xpose.msra.mxu1 %v1002_v7  ;;  %v1006_v13 = vpack.c.bf16 %v63_v10, %v62_v9  ;;  %v1008_v14 = vpack.c.bf16 %v81_v12, %v80_v11  ;;  %v1298_v16 = vld [vmem:[#allocation2 + $0x50] sm:$0xff]  ;;  %v64_v17 = vld [vmem:[#allocation5 + $0x20] sm:$0xff]  ;;  %v65_v18 = vld [vmem:[#allocation5 + $0x28] sm:$0xff]  ;;  %v1303_v5 = vand.u32 127, %v278_v4  ;;  %v1305_v6 = vshrl.u32 %v278_v4, 7 }
  0x2b   :  { %1005 = vmatprep.subr.bf16.mxu0 %v1004_v8  ;;  %1033 = vmatprep.subr.bf16.mxu1 %v1004_v8  ;;  %v82_v19 = vld [vmem:[#allocation5 + $0xb0] sm:$0xff]  ;;  %v83_v20 = vld [vmem:[#allocation5 + $0xb8] sm:$0xff]  ;;  %v1010_v21 = vpack.c.bf16 %v65_v18, %v64_v17  ;;  %v84_v25 = vld [vmem:[#allocation5 + $0xc0] sm:$0xff]  ;;  %p1224_p5 = por %p1223_p4, %p1222_p3 }
  0x2c   :  { %960 = vmatprep.mubr.f32.mxu0 %v1295_v15  ;;  %980 = vmatprep.mubr.f32.mxu1 %v1298_v16  ;;  %v1012_v22 = vpack.c.bf16 %v83_v20, %v82_v19  ;;  %v66_v23 = vld [vmem:[#allocation5 + $0x30] sm:$0xff]  ;;  %v67_v24 = vld [vmem:[#allocation5 + $0x38] sm:$0xff]  ;;  %v85_v26 = vld [vmem:[#allocation5 + $0xc8] sm:$0xff]  ;;  %v1308_v7 = vadd.s32 128, %v1303_v5  ;;  %v1311_v8 = vadd.s32 128, %v1305_v6  ;;  %v1316_v9 = vadd.s32 136, %v1305_v6 }
  0x2d   :  { %v1014_v27 = vpack.c.bf16 %v67_v24, %v66_v23  ;;  %v1016_v28 = vpack.c.bf16 %v85_v26, %v84_v25  ;;  %v68_v29 = vld [vmem:[#allocation5 + $0x40] sm:$0xff]  ;;  %v69_v30 = vld [vmem:[#allocation5 + $0x48] sm:$0xff]  ;;  %v86_v31 = vld [vmem:[#allocation5 + $0xd0] sm:$0xff]  ;;  %v1321_v10 = vadd.s32 144, %v1305_v6  ;;  %v1326_v11 = vadd.s32 152, %v1305_v6  ;;  %p1225_p6 = pnand %p1224_p5, %p1218_p2 }
  0x2e   :  { %v87_v32 = vld [vmem:[#allocation5 + $0xd8] sm:$0xff]  ;;  %v1018_v33 = vpack.c.bf16 %v69_v30, %v68_v29  ;;  %v70_v35 = vld [vmem:[#allocation5 + $0x50] sm:$0xff]  ;;  %v88_v37 = vld [vmem:[#allocation5 + $0xe0] sm:$0xff]  ;;  %vm356_vm0 = vcmp.eq.s32.totalorder %v1311_v8, %v1308_v7  ;;  %vm358_vm1 = vcmp.eq.s32.totalorder %v1316_v9, %v1308_v7  ;;  %vm464_vm4 = vcmp.lt.s32.totalorder %v1308_v7, 160 }
  0x2f   :  { %v1020_v34 = vpack.c.bf16 %v87_v32, %v86_v31  ;;  %v71_v36 = vld [vmem:[#allocation5 + $0x58] sm:$0xff]  ;;  %v89_v38 = vld [vmem:[#allocation5 + $0xe8] sm:$0xff]  ;;  %v72_v41 = vld [vmem:[#allocation5 + $0x60] sm:$0xff]  ;;  %vm360_vm2 = vcmp.eq.s32.totalorder %v1321_v10, %v1308_v7  ;;  %vm362_vm3 = vcmp.eq.s32.totalorder %v1326_v11, %v1308_v7  ;;  %v291_v17 = vadd.s32 96, %v1305_v6 }
  0x30   :  { %v1022_v39 = vpack.c.bf16 %v71_v36, %v70_v35  ;;  %v1024_v40 = vpack.c.bf16 %v89_v38, %v88_v37  ;;  %v73_v42 = vld [vmem:[#allocation5 + $0x68] sm:$0xff]  ;;  %v90_v43 = vld [vmem:[#allocation5 + $0xf0] sm:$0xff]  ;;  %v91_v44 = vld [vmem:[#allocation5 + $0xf8] sm:$0xff]  ;;  %v292_v25 = vadd.s32 104, %v1305_v6  ;;  %v293_v36 = vadd.s32 112, %v1305_v6 }
  0x31   :  { %v1026_v45 = vpack.c.bf16 %v73_v42, %v72_v41  ;;  %v1028_v46 = vpack.c.bf16 %v91_v44, %v90_v43  ;;  %v74_v47 = vld [vmem:[#allocation5 + $0x70] sm:$0xff]  ;;  %v75_v48 = vld [vmem:[#allocation5 + $0x78] sm:$0xff]  ;;  %v41_v50 = vld [vmem:[#allocation2 + $0x8] sm:$0xff]  ;;  %vm347_vm5 = vcmp.eq.s32.totalorder %v291_v17, %v1303_v5  ;;  %vm323_vm9 = vcmp.eq.s32.totalorder %v1305_v6, %v1303_v5 }
  0x32   :  { %1007 = vmatpush3.bf16.xpose.msra.mxu0 %v1006_v13  ;;  %1041 = vmatpush3.bf16.xpose.msra.mxu1 %v1006_v13  ;;  %v1030_v49 = vpack.c.bf16 %v75_v48, %v74_v47  ;;  %v51_v51 = vld [vmem:[#allocation2 + $0x58] sm:$0xff]  ;;  %v42_v52 = vld [vmem:[#allocation2 + $0x10] sm:$0xff]  ;;  %v52_v53 = vld [vmem:[#allocation2 + $0x60] sm:$0xff]  ;;  %vm349_vm6 = vcmp.eq.s32.totalorder %v292_v25, %v1303_v5  ;;  %vm351_vm7 = vcmp.eq.s32.totalorder %v293_v36, %v1303_v5  ;;  %v294_v47 = vadd.s32 120, %v1305_v6 }
  0x33   :  { %1009 = vmatprep.subr.bf16.mxu0 %v1008_v14  ;;  %1034 = vmatprep.subr.bf16.mxu1 %v1008_v14  ;;  %v43_v54 = vld [vmem:[#allocation2 + $0x18] sm:$0xff]  ;;  %v53_v55 = vld [vmem:[#allocation2 + $0x68] sm:$0xff]  ;;  %v44_v56 = vld [vmem:[#allocation2 + $0x20] sm:$0xff]  ;;  %v283_v7 = vadd.s32 32, %v1305_v6  ;;  %v282_v11 = vadd.s32 24, %v1305_v6 }
  0x34   :  { %v54_v57 = vld [vmem:[#allocation2 + $0x70] sm:$0xff]  ;;  %v45_v58 = vld [vmem:[#allocation2 + $0x28] sm:$0xff]  ;;  %v55_v59 = vld [vmem:[#allocation2 + $0x78] sm:$0xff]  ;;  %vm353_vm8 = vcmp.eq.s32.totalorder %v294_v47, %v1303_v5 }
  0x35   :  { %v46_v60 = vld [vmem:[#allocation2 + $0x30] sm:$0xff]  ;;  %v56_v61 = vld [vmem:[#allocation2 + $0x80] sm:$0xff]  ;;  %v47_v62 = vld [vmem:[#allocation2 + $0x38] sm:$0xff]  ;;  %vm331_vm12 = vcmp.eq.s32.totalorder %v283_v7, %v1303_v5  ;;  %vm329_vm13 = vcmp.eq.s32.totalorder %v282_v11, %v1303_v5 }
  0x36   :  { %v57_v63 = vld [vmem:[#allocation2 + $0x88] sm:$0xff]  ;;  %v48_v0 = vld [vmem:[#allocation2 + $0x40] sm:$0xff]  ;;  %v58_v1 = vld [vmem:[#allocation2 + $0x90] sm:$0xff] }
  0x37   :  { %v49_v2 = vld [vmem:[#allocation2 + $0x48] sm:$0xff]  ;;  %v59_v3 = vld [vmem:[#allocation2 + $0x98] sm:$0xff] }
  0x3a   :  { %1011 = vmatpush3.bf16.xpose.msra.mxu0 %v1010_v21  ;;  %1042 = vmatpush3.bf16.xpose.msra.mxu1 %v1010_v21 }
  0x3b   :  { %1013 = vmatprep.subr.bf16.mxu0 %v1012_v22  ;;  %1035 = vmatprep.subr.bf16.mxu1 %v1012_v22 }
  0x42   :  { %1015 = vmatpush3.bf16.xpose.msra.mxu0 %v1014_v27  ;;  %1043 = vmatpush3.bf16.xpose.msra.mxu1 %v1014_v27 }
  0x43   :  { %1017 = vmatprep.subr.bf16.mxu0 %v1016_v28  ;;  %1036 = vmatprep.subr.bf16.mxu1 %v1016_v28 }
  0x4a   :  { %1019 = vmatpush3.bf16.xpose.msra.mxu0 %v1018_v33  ;;  %1044 = vmatpush3.bf16.xpose.msra.mxu1 %v1018_v33 }
  0x4b   :  { %1021 = vmatprep.subr.bf16.mxu0 %v1020_v34  ;;  %1037 = vmatprep.subr.bf16.mxu1 %v1020_v34 }
  0x52   :  { %1023 = vmatpush3.bf16.xpose.msra.mxu0 %v1022_v39  ;;  %1045 = vmatpush3.bf16.xpose.msra.mxu1 %v1022_v39 }
  0x53   :  { %1025 = vmatprep.subr.bf16.mxu0 %v1024_v40  ;;  %1038 = vmatprep.subr.bf16.mxu1 %v1024_v40 }
  0x5a   :  { %1027 = vmatpush3.bf16.xpose.msra.mxu0 %v1026_v45  ;;  %1046 = vmatpush3.bf16.xpose.msra.mxu1 %v1026_v45 }
  0x5b   :  { %1029 = vmatprep.subr.bf16.mxu0 %v1028_v46  ;;  %1039 = vmatprep.subr.bf16.mxu1 %v1028_v46 }
  0x62   :  { %1031 = vmatpush3.bf16.xpose.msra.mxu0 %v1030_v49  ;;  %1047 = vmatpush3.bf16.xpose.msra.mxu1 %v1030_v49 }
  0x69   :  { %961 = vmatmul.mubr.f32.vlgmr.msra.gmra.mrb[0].mxu0 %v1295_v15  ;;  %981 = vmatmul.mubr.f32.vlgmr.msra.gmra.mrb[0].mxu1 %v1298_v16 }
  0x6a   :  { %962 = vmatprep.mubr.f32.mxu0 %v41_v50  ;;  %982 = vmatprep.mubr.f32.mxu1 %v51_v51 }
  0x6d   :  { %963 = vmatmul.mubr.f32.gmra.mrb[2].mxu0 %v41_v50  ;;  %983 = vmatmul.mubr.f32.gmra.mrb[2].mxu1 %v51_v51 }
  0x6e   :  { %964 = vmatprep.mubr.f32.mxu0 %v42_v52  ;;  %984 = vmatprep.mubr.f32.mxu1 %v52_v53 }
  0x71   :  { %965 = vmatmul.mubr.f32.gmra.mrb[4].mxu0 %v42_v52  ;;  %985 = vmatmul.mubr.f32.gmra.mrb[4].mxu1 %v52_v53 }
  0x72   :  { %966 = vmatprep.mubr.f32.mxu0 %v43_v54  ;;  %986 = vmatprep.mubr.f32.mxu1 %v53_v55 }
  0x75   :  { %967 = vmatmul.mubr.f32.gmra.mrb[6].mxu0 %v43_v54  ;;  %987 = vmatmul.mubr.f32.gmra.mrb[6].mxu1 %v53_v55 }
  0x76   :  { %968 = vmatprep.mubr.f32.mxu0 %v44_v56  ;;  %988 = vmatprep.mubr.f32.mxu1 %v54_v57 }
  0x79   :  { %969 = vmatmul.mubr.f32.gmra.mrb[8].mxu0 %v44_v56  ;;  %989 = vmatmul.mubr.f32.gmra.mrb[8].mxu1 %v54_v57 }
  0x7a   :  { %970 = vmatprep.mubr.f32.mxu0 %v45_v58  ;;  %990 = vmatprep.mubr.f32.mxu1 %v55_v59 }
  0x7d   :  { %971 = vmatmul.mubr.f32.gmra.mrb[10].mxu0 %v45_v58  ;;  %991 = vmatmul.mubr.f32.gmra.mrb[10].mxu1 %v55_v59 }
  0x7e   :  { %972 = vmatprep.mubr.f32.mxu0 %v46_v60  ;;  %992 = vmatprep.mubr.f32.mxu1 %v56_v61 }
  0x81   :  { %973 = vmatmul.mubr.f32.gmra.mrb[12].mxu0 %v46_v60  ;;  %993 = vmatmul.mubr.f32.gmra.mrb[12].mxu1 %v56_v61 }
  0x82   :  { %974 = vmatprep.mubr.f32.mxu0 %v47_v62  ;;  %994 = vmatprep.mubr.f32.mxu1 %v57_v63 }
  0x85   :  { %975 = vmatmul.mubr.f32.gmra.mrb[14].mxu0 %v47_v62  ;;  %995 = vmatmul.mubr.f32.gmra.mrb[14].mxu1 %v57_v63 }
  0x86   :  { %976 = vmatprep.mubr.f32.mxu0 %v48_v0  ;;  %996 = vmatprep.mubr.f32.mxu1 %v58_v1 }
  0x89   :  { %977 = vmatmul.mubr.f32.gmra.mrb[16].mxu0 %v48_v0  ;;  %997 = vmatmul.mubr.f32.gmra.mrb[16].mxu1 %v58_v1 }
  0x8a   :  { %978 = vmatprep.mubr.f32.mxu0 %v49_v2  ;;  %998 = vmatprep.mubr.f32.mxu1 %v59_v3 }
  0x8d   :  { %979 = vmatmul.mubr.f32.gmra.mrb[18].mxu0 %v49_v2  ;;  %999 = vmatmul.mubr.f32.gmra.mrb[18].mxu1 %v59_v3 }
 0x13c   :  { %v1331_v12 = vpop.f32.mrb[0].mxu0  ;;  %v1333_v13 = vpop.f32.mrb[0].mxu1 }
 0x13d   :  { %v160_v14 = vpop.f32.mrb[1].mxu0  ;;  %v220_v15 = vpop.f32.mrb[1].mxu1 }
 0x13e   :  { %v1337_v16 = vsel %vm464_vm4, %v160_v14, -inf  ;;  %v1344_v19 = vsel %vm464_vm4, %v220_v15, -inf }
 0x13f   :  { %v509_v18 = vmax.f32 %v1331_v12, %v1337_v16  ;;  %v539_v27 = vmax.f32 %v1333_v13, %v1344_v19 }
 0x140   :  { %v1346_v20 = vpop.f32.mrb[2].mxu1  ;;  %v1348_v21 = vpop.f32.mrb[2].mxu0 }
 0x141   :  { %v226_v22 = vpop.f32.mrb[3].mxu1  ;;  %510 = vmax.xlane.f32.xlu0 %v509_v18  ;;  %v166_v23 = vpop.f32.mrb[3].mxu0 }
 0x142   :  { %v1352_v24 = vsel %vm464_vm4, %v226_v22, -inf  ;;  %v1362_v28 = vsel %vm464_vm4, %v166_v23, -inf }
 0x143   :  { %v542_v26 = vmax.f32 %v1346_v20, %v1352_v24  ;;  %v512_v37 = vmax.f32 %v1348_v21, %v1362_v28 }
 0x144   :  { %v1364_v29 = vpop.f32.mrb[4].mxu0  ;;  %v1366_v30 = vpop.f32.mrb[4].mxu1 }
 0x145   :  { %543 = vmax.xlane.f32.xlu1 %v542_v26  ;;  %540 = vmax.xlane.f32.xlu0 %v539_v27  ;;  %v172_v31 = vpop.f32.mrb[5].mxu0  ;;  %v232_v32 = vpop.f32.mrb[5].mxu1  ;;  %v1369_v33 = vsel %vm347_vm5, %v1366_v30, 0.0  ;;  %vm869_vm5 = vcmp.eq.s32.totalorder %v1303_v5, 0 }
 0x146   :  { %v1373_v34 = vsel %vm464_vm4, %v172_v31, -inf  ;;  %v1377_v35 = vsel %vm464_vm4, %v232_v32, -inf }
 0x147   :  { %v515_v38 = vmax.f32 %v1364_v29, %v1373_v34  ;;  %v545_v43 = vmax.f32 %v1366_v30, %v1377_v35 }
 0x148   :  { %v1385_v39 = vpop.f32.mrb[6].mxu0  ;;  %v1387_v40 = vpop.f32.mrb[6].mxu1 }
 0x149   :  { %513 = vmax.xlane.f32.xlu0 %v512_v37  ;;  %516 = vmax.xlane.f32.xlu1 %v515_v38  ;;  %v178_v41 = vpop.f32.mrb[7].mxu0  ;;  %v238_v42 = vpop.f32.mrb[7].mxu1  ;;  %v1392_v44 = vsel %vm349_vm6, %v1387_v40, 0.0 }
 0x14a   :  { %v1396_v45 = vsel %vm464_vm4, %v178_v41, -inf  ;;  %v1400_v46 = vsel %vm464_vm4, %v238_v42, -inf }
 0x14b   :  { %v518_v48 = vmax.f32 %v1385_v39, %v1396_v45  ;;  %v548_v53 = vmax.f32 %v1387_v40, %v1400_v46 }
 0x14c   :  { %v1406_v49 = vpop.f32.mrb[8].mxu0  ;;  %v1408_v50 = vpop.f32.mrb[8].mxu1 }
 0x14d   :  { %546 = vmax.xlane.f32.xlu0 %v545_v43  ;;  %519 = vmax.xlane.f32.xlu1 %v518_v48  ;;  %v184_v51 = vpop.f32.mrb[9].mxu0  ;;  %v244_v52 = vpop.f32.mrb[9].mxu1  ;;  %v1413_v54 = vsel %vm351_vm7, %v1408_v50, 0.0 }
 0x14e   :  { %v1417_v55 = vsel %vm464_vm4, %v184_v51, -inf  ;;  %v1421_v56 = vsel %vm464_vm4, %v244_v52, -inf }
 0x14f   :  { %v521_v57 = vmax.f32 %v1406_v49, %v1417_v55  ;;  %v551_v62 = vmax.f32 %v1408_v50, %v1421_v56 }
 0x150   :  { %v1426_v58 = vpop.f32.mrb[10].mxu0  ;;  %v1428_v59 = vpop.f32.mrb[10].mxu1 }
 0x151   :  { %549 = vmax.xlane.f32.xlu1 %v548_v53  ;;  %522 = vmax.xlane.f32.xlu0 %v521_v57  ;;  %v190_v60 = vpop.f32.mrb[11].mxu0  ;;  %v250_v61 = vpop.f32.mrb[11].mxu1  ;;  %v1433_v63 = vsel %vm353_vm8, %v1428_v59, 0.0 }
 0x152   :  { %v1437_v0 = vsel %vm464_vm4, %v190_v60, -inf  ;;  %v1441_v1 = vsel %vm464_vm4, %v250_v61, -inf }
 0x153   :  { %v524_v2 = vmax.f32 %v1426_v58, %v1437_v0  ;;  %v554_v17 = vmax.f32 %v1428_v59, %v1441_v1 }
 0x154   :  { %v1445_v3 = vpop.f32.mrb[12].mxu0  ;;  %v1447_v4 = vpop.f32.mrb[12].mxu1 }
 0x155   :  { %552 = vmax.xlane.f32.xlu0 %v551_v62  ;;  %525 = vmax.xlane.f32.xlu1 %v524_v2  ;;  %v196_v14 = vpop.f32.mrb[13].mxu0  ;;  %v256_v15 = vpop.f32.mrb[13].mxu1 }
 0x156   :  { %v1453_v18 = vsel %vm464_vm4, %v196_v14, -inf  ;;  %v1457_v22 = vsel %vm464_vm4, %v256_v15, -inf  ;;  %v1462_v23 = vsel %vm356_vm0, %v256_v15, 0.0 }
 0x157   :  { %v527_v25 = vmax.f32 %v1445_v3, %v1453_v18  ;;  %v557_v36 = vmax.f32 %v1447_v4, %v1457_v22 }
 0x158   :  { %v1466_v26 = vpop.f32.mrb[14].mxu0  ;;  %v1468_v27 = vpop.f32.mrb[14].mxu1 }
 0x159   :  { %555 = vmax.xlane.f32.xlu1 %v554_v17  ;;  %528 = vmax.xlane.f32.xlu0 %v527_v25  ;;  %v202_v31 = vpop.f32.mrb[15].mxu0  ;;  %v262_v32 = vpop.f32.mrb[15].mxu1 }
 0x15a   :  { %v1474_v37 = vsel %vm464_vm4, %v202_v31, -inf  ;;  %v1478_v8 = vsel %vm464_vm4, %v262_v32, -inf  ;;  %v1483_v38 = vsel %vm358_vm1, %v262_v32, 0.0  ;;  %v281_v32 = vadd.s32 16, %v1305_v6 }
 0x15b   :  { %v530_v41 = vmax.f32 %v1466_v26, %v1474_v37  ;;  %v560_v51 = vmax.f32 %v1468_v27, %v1478_v8 }
 0x15c   :  { %v1487_v42 = vpop.f32.mrb[16].mxu0  ;;  %v1489_v43 = vpop.f32.mrb[16].mxu1  ;;  %vm327_vm10 = vcmp.eq.s32.totalorder %v281_v32, %v1303_v5 }
 0x15d   :  { %558 = vmax.xlane.f32.xlu0 %v557_v36  ;;  %531 = vmax.xlane.f32.xlu1 %v530_v41  ;;  %v208_v47 = vpop.f32.mrb[17].mxu0  ;;  %v268_v48 = vpop.f32.mrb[17].mxu1  ;;  %v280_v36 = vadd.s32 8, %v1305_v6  ;;  %v363_v41 = vsel %vm323_vm9, %v1331_v12, 0.0 }
 0x15e   :  { %v1495_v52 = vsel %vm464_vm4, %v208_v47, -inf  ;;  %v1499_v9 = vsel %vm464_vm4, %v268_v48, -inf  ;;  %v1504_v53 = vsel %vm360_vm2, %v268_v48, 0.0  ;;  %v367_v47 = vsel %vm327_vm10, %v1364_v29, 0.0 }
 0x15f   :  { %v533_v57 = vmax.f32 %v1487_v42, %v1495_v52  ;;  %v563_v14 = vmax.f32 %v1489_v43, %v1499_v9  ;;  %vm325_vm11 = vcmp.eq.s32.totalorder %v280_v36, %v1303_v5  ;;  %v289_v36 = vadd.s32 80, %v1305_v6 }
 0x160   :  { %v1508_v60 = vpop.f32.mrb[18].mxu0  ;;  %v1510_v61 = vpop.f32.mrb[18].mxu1  ;;  %v365_v48 = vsel %vm325_vm11, %v1348_v21, 0.0 }
 0x161   :  { %561 = vmax.xlane.f32.xlu1 %v560_v51  ;;  %534 = vmax.xlane.f32.xlu0 %v533_v57  ;;  %v214_v62 = vpop.f32.mrb[19].mxu0  ;;  %v274_v2 = vpop.f32.mrb[19].mxu1  ;;  %v285_v51 = vadd.s32 48, %v1305_v6  ;;  %v284_v57 = vadd.s32 40, %v1305_v6  ;;  %vm343_vm2 = vcmp.eq.s32.totalorder %v289_v36, %v1303_v5 }
 0x162   :  { %v1516_v15 = vsel %vm464_vm4, %v214_v62, -inf  ;;  %v1520_v10 = vsel %vm464_vm4, %v274_v2, -inf  ;;  %v1525_v17 = vsel %vm362_vm3, %v274_v2, 0.0  ;;  %v371_v62 = vsel %vm331_vm12, %v1406_v49, 0.0 }
 0x163   :  { %v536_v25 = vmax.f32 %v1508_v60, %v1516_v15  ;;  %v566_v31 = vmax.f32 %v1510_v61, %v1520_v10  ;;  %v369_v2 = vsel %vm329_vm13, %v1385_v39, 0.0  ;;  %vm335_vm14 = vcmp.eq.s32.totalorder %v285_v51, %v1303_v5 }
 0x164   :  { %vm333_vm15 = vcmp.eq.s32.totalorder %v284_v57, %v1303_v5 }
 0x165   :  { %564 = vmax.xlane.f32.xlu0 %v563_v14  ;;  %537 = vmax.xlane.f32.xlu1 %v536_v25  ;;  %v287_v14 = vadd.s32 64, %v1305_v6  ;;  %v286_v25 = vadd.s32 56, %v1305_v6  ;;  %v373_v32 = vsel %vm333_vm15, %v1426_v58, 0.0 }
 0x167   :  { %vm339_vm0 = vcmp.eq.s32.totalorder %v287_v14, %v1303_v5  ;;  %vm337_vm1 = vcmp.eq.s32.totalorder %v286_v25, %v1303_v5 }
 0x168   :  { %v379_v7 = vsel %vm339_vm0, %v1487_v42, 0.0  ;;  %v377_v11 = vsel %vm337_vm1, %v1466_v26, 0.0 }
 0x169   :  { %404 = vadd.xlane.f32.xlu0 %v363_v41  ;;  %567 = vmax.xlane.f32.xlu1 %v566_v31  ;;  %v375_v31 = vsel %vm335_vm14, %v1445_v3, 0.0  ;;  %v288_v41 = vadd.s32 72, %v1305_v6 }
 0x16b   :  { %vm341_vm3 = vcmp.eq.s32.totalorder %v288_v41, %v1303_v5 }
 0x16c   :  { %v381_v51 = vsel %vm341_vm3, %v1508_v60, 0.0 }
 0x16d   :  { %410 = vadd.xlane.f32.xlu0 %v367_v47  ;;  %407 = vadd.xlane.f32.xlu1 %v365_v48  ;;  %v290_v47 = vadd.s32 88, %v1305_v6  ;;  %v383_v48 = vsel %vm343_vm2, %v1333_v13, 0.0 }
 0x16f   :  { %vm345_vm4 = vcmp.eq.s32.totalorder %v290_v47, %v1303_v5 }
 0x170   :  { %v385_v57 = vsel %vm345_vm4, %v1346_v20, 0.0 }
 0x171   :  { %416 = vadd.xlane.f32.xlu0 %v371_v62  ;;  %413 = vadd.xlane.f32.xlu1 %v369_v2 }
 0x175   :  { %422 = vadd.xlane.f32.xlu0 %v375_v31  ;;  %419 = vadd.xlane.f32.xlu1 %v373_v32 }
 0x179   :  { %428 = vadd.xlane.f32.xlu0 %v379_v7  ;;  %425 = vadd.xlane.f32.xlu1 %v377_v11 }
 0x17d   :  { %434 = vadd.xlane.f32.xlu0 %v383_v48  ;;  %431 = vadd.xlane.f32.xlu1 %v381_v51 }
 0x181   :  { %437 = vadd.xlane.f32.xlu1 %v385_v57 }
 0x1ce   :  { %v1567_v62 = vpop.xlane.xlu0 %510 }
 0x1cf   :  { %v569_v2 = vsub.f32 %v1331_v12, %v1567_v62  ;;  %v570_v14 = vsub.f32 %v1337_v16, %v1567_v62 }
 0x1d1   :  { %v609_v6 = vmul.f32 1.442695, %v569_v2  ;;  %v611_v25 = vmul.f32 1.442695, %v570_v14 }
 0x1d2   :  { %v1573_v31 = vpop.xlane.xlu1 %543  ;;  %v1575_v32 = vpop.xlane.xlu0 %540 }
 0x1d3   :  { %1053 = vpow2.f32 %v609_v6  ;;  %v591_v36 = vsub.f32 %v1346_v20, %v1573_v31  ;;  %v592_v41 = vsub.f32 %v1352_v24, %v1573_v31  ;;  %v589_v7 = vsub.f32 %v1333_v13, %v1575_v32 }
 0x1d4   :  { %1055 = vpow2.f32 %v611_v25  ;;  %v590_v12 = vsub.f32 %v1344_v19, %v1575_v32 }
 0x1d5   :  { %v653_v16 = vmul.f32 1.442695, %v591_v36  ;;  %v655_v11 = vmul.f32 1.442695, %v592_v41  ;;  %v649_v47 = vmul.f32 1.442695, %v589_v7 }
 0x1d6   :  { %v651_v48 = vmul.f32 1.442695, %v590_v12  ;;  %v1585_v51 = vpop.xlane.xlu0 %513  ;;  %v1587_v57 = vpop.xlane.xlu1 %516 }
 0x1d7   :  { %1057 = vpow2.f32 %v653_v16  ;;  %v571_v20 = vsub.f32 %v1348_v21, %v1585_v51  ;;  %v572_v24 = vsub.f32 %v1362_v28, %v1585_v51  ;;  %v573_v13 = vsub.f32 %v1364_v29, %v1587_v57 }
 0x1d8   :  { %1059 = vpow2.f32 %v655_v11  ;;  %v574_v19 = vsub.f32 %v1373_v34, %v1587_v57 }
 0x1d9   :  { %1061 = vpow2.f32 %v649_v47  ;;  %v613_v2 = vmul.f32 1.442695, %v571_v20  ;;  %v615_v14 = vmul.f32 1.442695, %v572_v24  ;;  %v617_v6 = vmul.f32 1.442695, %v573_v13 }
 0x1da   :  { %1063 = vpow2.f32 %v651_v48  ;;  %v619_v25 = vmul.f32 1.442695, %v574_v19  ;;  %v1597_v36 = vpop.xlane.xlu0 %546  ;;  %v1599_v41 = vpop.xlane.xlu1 %519 }
 0x1db   :  { %1065 = vpow2.f32 %v613_v2  ;;  %v593_v21 = vsub.f32 %v1366_v30, %v1597_v36  ;;  %v594_v28 = vsub.f32 %v1377_v35, %v1597_v36  ;;  %v575_v29 = vsub.f32 %v1385_v39, %v1599_v41 }
 0x1dc   :  { %1067 = vpow2.f32 %v615_v14  ;;  %v576_v34 = vsub.f32 %v1396_v45, %v1599_v41 }
 0x1dd   :  { %v1054_v7 = vpop.eup %1053  ;;  %1069 = vpow2.f32 %v617_v6  ;;  %v657_v12 = vmul.f32 1.442695, %v593_v21  ;;  %v659_v16 = vmul.f32 1.442695, %v594_v28  ;;  %v621_v11 = vmul.f32 1.442695, %v575_v29 }
 0x1de   :  { %v1056_v47 = vpop.eup %1055  ;;  %1071 = vpow2.f32 %v619_v25  ;;  %v623_v48 = vmul.f32 1.442695, %v576_v34  ;;  %v1609_v20 = vpop.xlane.xlu1 %549 }
 0x1df   :  { %v1611_v30 = vpop.xlane.xlu0 %522  ;;  %1073 = vpow2.f32 %v657_v12  ;;  %v595_v35 = vsub.f32 %v1387_v40, %v1609_v20  ;;  %v596_v39 = vsub.f32 %v1400_v46, %v1609_v20  ;;  %v689_v13 = vadd.f32 %v1056_v47, %v1054_v7 }
 0x1e0   :  { %v577_v45 = vsub.f32 %v1406_v49, %v1611_v30  ;;  %1075 = vpow2.f32 %v659_v16  ;;  %v578_v24 = vsub.f32 %v1417_v55, %v1611_v30 }
 0x1e1   :  { %v1058_v19 = vpop.eup %1057  ;;  %1077 = vpow2.f32 %v621_v11  ;;  %v661_v2 = vmul.f32 1.442695, %v595_v35  ;;  %v663_v14 = vmul.f32 1.442695, %v596_v39  ;;  %690 = vadd.xlane.f32.xlu0 %v689_v13 }
 0x1e2   :  { %v625_v6 = vmul.f32 1.442695, %v577_v45  ;;  %v1060_v25 = vpop.eup %1059  ;;  %1079 = vpow2.f32 %v623_v48  ;;  %v627_v21 = vmul.f32 1.442695, %v578_v24  ;;  %v1623_v46 = vpop.xlane.xlu1 %525 }
 0x1e3   :  { %v1621_v40 = vpop.xlane.xlu0 %552  ;;  %v1062_v28 = vpop.eup %1061  ;;  %1081 = vpow2.f32 %v661_v2  ;;  %v579_v29 = vsub.f32 %v1426_v58, %v1623_v46  ;;  %v580_v7 = vsub.f32 %v1437_v0, %v1623_v46 }
 0x1e4   :  { %v597_v49 = vsub.f32 %v1408_v50, %v1621_v40  ;;  %v598_v55 = vsub.f32 %v1421_v56, %v1621_v40  ;;  %v1064_v34 = vpop.eup %1063  ;;  %1083 = vpow2.f32 %v663_v14 }
 0x1e5   :  { %v1066_v12 = vpop.eup %1065  ;;  %1085 = vpow2.f32 %v625_v6  ;;  %v629_v47 = vmul.f32 1.442695, %v579_v29  ;;  %v631_v35 = vmul.f32 1.442695, %v580_v7  ;;  %v719_v50 = vadd.f32 %v1064_v34, %v1062_v28 }
 0x1e6   :  { %v665_v16 = vmul.f32 1.442695, %v597_v49  ;;  %v667_v11 = vmul.f32 1.442695, %v598_v55  ;;  %v1068_v48 = vpop.eup %1067  ;;  %1087 = vpow2.f32 %v627_v21  ;;  %v1633_v39 = vpop.xlane.xlu1 %555 }
 0x1e7   :  { %v1635_v56 = vpop.xlane.xlu0 %528  ;;  %v1070_v45 = vpop.eup %1069  ;;  %v599_v58 = vsub.f32 %v1428_v59, %v1633_v39  ;;  %v600_v0 = vsub.f32 %v1441_v1, %v1633_v39  ;;  %720 = vadd.xlane.f32.xlu0 %v719_v50  ;;  %v692_v14 = vadd.f32 %v1068_v48, %v1066_v12  ;;  %v722_v48 = vadd.f32 %v1060_v25, %v1058_v19 }
 0x1e8   :  { %1089 = vpow2.f32 %v665_v16  ;;  %v581_v24 = vsub.f32 %v1445_v3, %v1635_v56  ;;  %v1072_v13 = vpop.eup %1071  ;;  %v582_v2 = vsub.f32 %v1453_v18, %v1635_v56 }
 0x1e9   :  { %1091 = vpow2.f32 %v667_v11  ;;  %v1074_v6 = vpop.eup %1073  ;;  %v669_v21 = vmul.f32 1.442695, %v599_v58  ;;  %v671_v28 = vmul.f32 1.442695, %v600_v0  ;;  %v695_v29 = vadd.f32 %v1072_v13, %v1070_v45  ;;  %693 = vadd.xlane.f32.xlu1 %v692_v14 }
 0x1ea   :  { %1093 = vpow2.f32 %v629_v47  ;;  %v633_v49 = vmul.f32 1.442695, %v581_v24  ;;  %v1076_v55 = vpop.eup %1075  ;;  %v635_v59 = vmul.f32 1.442695, %v582_v2  ;;  %v1647_v3 = vpop.xlane.xlu1 %531 }
 0x1eb   :  { %1095 = vpow2.f32 %v631_v35  ;;  %v1645_v1 = vpop.xlane.xlu0 %558  ;;  %v1078_v34 = vpop.eup %1077  ;;  %v583_v12 = vsub.f32 %v1466_v26, %v1647_v3  ;;  %696 = vadd.xlane.f32.xlu0 %v695_v29  ;;  %v584_v11 = vsub.f32 %v1474_v37, %v1647_v3  ;;  %v725_v47 = vadd.f32 %v1076_v55, %v1074_v6 }
 0x1ec   :  { %1097 = vpow2.f32 %v669_v21  ;;  %v601_v18 = vsub.f32 %v1447_v4, %v1645_v1  ;;  %v602_v7 = vsub.f32 %v1457_v22, %v1645_v1  ;;  %v1080_v16 = vpop.eup %1079 }
 0x1ed   :  { %1099 = vpow2.f32 %v671_v28  ;;  %v1082_v35 = vpop.eup %1081  ;;  %v637_v58 = vmul.f32 1.442695, %v583_v12  ;;  %v639_v0 = vmul.f32 1.442695, %v584_v11  ;;  %723 = vadd.xlane.f32.xlu1 %v722_v48  ;;  %v698_v14 = vadd.f32 %v1080_v16, %v1078_v34 }
 0x1ee   :  { %1101 = vpow2.f32 %v633_v49  ;;  %v673_v50 = vmul.f32 1.442695, %v601_v18  ;;  %v675_v45 = vmul.f32 1.442695, %v602_v7  ;;  %v1084_v4 = vpop.eup %1083  ;;  %v1657_v22 = vpop.xlane.xlu1 %561 }
 0x1ef   :  { %1103 = vpow2.f32 %v635_v59  ;;  %v1659_v26 = vpop.xlane.xlu0 %534  ;;  %v1086_v24 = vpop.eup %1085  ;;  %v603_v37 = vsub.f32 %v1468_v27, %v1657_v22  ;;  %v604_v19 = vsub.f32 %v1478_v8, %v1657_v22  ;;  %726 = vadd.xlane.f32.xlu0 %v725_v47  ;;  %v728_v11 = vadd.f32 %v1084_v4, %v1082_v35 }
 0x1f0   :  { %1105 = vpow2.f32 %v673_v50  ;;  %v585_v25 = vsub.f32 %v1487_v42, %v1659_v26  ;;  %v1088_v13 = vpop.eup %1087  ;;  %v586_v2 = vsub.f32 %v1495_v52, %v1659_v26 }
 0x1f1   :  { %1107 = vpow2.f32 %v675_v45  ;;  %v677_v21 = vmul.f32 1.442695, %v603_v37  ;;  %v679_v28 = vmul.f32 1.442695, %v604_v19  ;;  %v701_v59 = vadd.f32 %v1088_v13, %v1086_v24  ;;  %699 = vadd.xlane.f32.xlu1 %v698_v14 }
 0x1f2   :  { %v1090_v6 = vpop.eup %1089  ;;  %1109 = vpow2.f32 %v637_v58  ;;  %v641_v49 = vmul.f32 1.442695, %v585_v25  ;;  %v643_v27 = vmul.f32 1.442695, %v586_v2  ;;  %v1671_v42 = vpop.xlane.xlu1 %537 }
 0x1f3   :  { %v1092_v55 = vpop.eup %1091  ;;  %1111 = vpow2.f32 %v639_v0  ;;  %v1669_v8 = vpop.xlane.xlu0 %564  ;;  %v587_v18 = vsub.f32 %v1508_v60, %v1671_v42  ;;  %702 = vadd.xlane.f32.xlu0 %v701_v59  ;;  %v588_v12 = vsub.f32 %v1516_v15, %v1671_v42 }
 0x1f4   :  { %v1094_v29 = vpop.eup %1093  ;;  %1113 = vpow2.f32 %v677_v21  ;;  %v605_v52 = vsub.f32 %v1489_v43, %v1669_v8  ;;  %v606_v34 = vsub.f32 %v1499_v9, %v1669_v8  ;;  %v731_v16 = vadd.f32 %v1092_v55, %v1090_v6 }
 0x1f5   :  { %v1096_v7 = vpop.eup %1095  ;;  %1115 = vpow2.f32 %v679_v28  ;;  %v645_v43 = vmul.f32 1.442695, %v587_v18  ;;  %729 = vadd.xlane.f32.xlu1 %v728_v11  ;;  %v647_v60 = vmul.f32 1.442695, %v588_v12 }
 0x1f6   :  { %v1098_v47 = vpop.eup %1097  ;;  %1117 = vpow2.f32 %v641_v49  ;;  %v681_v48 = vmul.f32 1.442695, %v605_v52  ;;  %v683_v50 = vmul.f32 1.442695, %v606_v34  ;;  %v1681_v9 = vpop.xlane.xlu1 %567  ;;  %v704_v4 = vadd.f32 %v1096_v7, %v1094_v29 }
 0x1f7   :  { %v1100_v45 = vpop.eup %1099  ;;  %1119 = vpow2.f32 %v643_v27  ;;  %v607_v0 = vsub.f32 %v1510_v61, %v1681_v9  ;;  %v608_v15 = vsub.f32 %v1520_v10, %v1681_v9  ;;  %732 = vadd.xlane.f32.xlu0 %v731_v16 }
 0x1f8   :  { %v1102_v58 = vpop.eup %1101  ;;  %1121 = vpow2.f32 %v681_v48  ;;  %v734_v61 = vadd.f32 %v1100_v45, %v1098_v47  ;;  %v405_v48 = vpop.xlane.xlu0 %404 }
 0x1f9   :  { %v1104_v35 = vpop.eup %1103  ;;  %1123 = vpow2.f32 %v683_v50  ;;  %v685_v25 = vmul.f32 1.442695, %v607_v0  ;;  %705 = vadd.xlane.f32.xlu1 %v704_v4  ;;  %v687_v2 = vmul.f32 1.442695, %v608_v15 }
 0x1fa   :  { %v1106_v24 = vpop.eup %1105  ;;  %v707_v37 = vadd.f32 %v1104_v35, %v1102_v58  ;;  %1125 = vpow2.f32 %v645_v43  ;;  %v408_v45 = vpop.xlane.xlu1 %407 }
 0x1fb   :  { %v1108_v19 = vpop.eup %1107  ;;  %1127 = vpow2.f32 %v647_v60 }
 0x1fc   :  { %v1110_v13 = vpop.eup %1109  ;;  %708 = vadd.xlane.f32.xlu0 %v707_v37  ;;  %v737_v6 = vadd.f32 %v1108_v19, %v1106_v24  ;;  %1129 = vpow2.f32 %v685_v25  ;;  %v411_v50 = vpop.xlane.xlu0 %410 }
 0x1fd   :  { %v1112_v14 = vpop.eup %1111  ;;  %735 = vadd.xlane.f32.xlu1 %v734_v61  ;;  %1131 = vpow2.f32 %v687_v2 }
 0x1fe   :  { %v1114_v21 = vpop.eup %1113  ;;  %v710_v55 = vadd.f32 %v1112_v14, %v1110_v13  ;;  %v1697_v43 = vpop.xlane.xlu1 %413 }
 0x1ff   :  { %v1116_v28 = vpop.eup %1115 }
 0x200   :  { %v1118_v10 = vpop.eup %1117  ;;  %738 = vadd.xlane.f32.xlu0 %v737_v6  ;;  %v740_v18 = vadd.f32 %v1116_v28, %v1114_v21 }
 0x201   :  { %v1120_v49 = vpop.eup %1119  ;;  %711 = vadd.xlane.f32.xlu1 %v710_v55 }
 0x202   :  { %v1122_v27 = vpop.eup %1121  ;;  %v713_v59 = vadd.f32 %v1120_v49, %v1118_v10 }
 0x203   :  { %v1124_v29 = vpop.eup %1123 }
 0x204   :  { %v1126_v52 = vpop.eup %1125  ;;  %714 = vadd.xlane.f32.xlu0 %v713_v59  ;;  %v743_v34 = vadd.f32 %v1124_v29, %v1122_v27 }
 0x205   :  { %v1128_v7 = vpop.eup %1127  ;;  %741 = vadd.xlane.f32.xlu1 %v740_v18 }
 0x206   :  { %v1130_v12 = vpop.eup %1129  ;;  %v716_v16 = vadd.f32 %v1128_v7, %v1126_v52 }
 0x207   :  { %v1132_v11 = vpop.eup %1131 }
 0x208   :  { %744 = vadd.xlane.f32.xlu0 %v743_v34  ;;  %v746_v47 = vadd.f32 %v1132_v11, %v1130_v12 }
 0x209   :  { %717 = vadd.xlane.f32.xlu1 %v716_v16 }
 0x20c   :  { %440 = vadd.xlane.f32.xlu0 %v1369_v33  ;;  %v1695_v33 = vpop.xlane.xlu0 %416 }
 0x20d   :  { %747 = vadd.xlane.f32.xlu1 %v746_v47 }
 0x210   :  { %446 = vadd.xlane.f32.xlu0 %v1413_v54  ;;  %v1699_v54 = vpop.xlane.xlu0 %422 }
 0x211   :  { %443 = vadd.xlane.f32.xlu1 %v1392_v44  ;;  %v1701_v44 = vpop.xlane.xlu1 %419 }
 0x214   :  { %452 = vadd.xlane.f32.xlu0 %v1462_v23  ;;  %v1703_v23 = vpop.xlane.xlu0 %428 }
 0x215   :  { %449 = vadd.xlane.f32.xlu1 %v1433_v63  ;;  %v1705_v63 = vpop.xlane.xlu1 %425 }
 0x218   :  { %458 = vadd.xlane.f32.xlu0 %v1504_v53  ;;  %v435_v53 = vpop.xlane.xlu0 %434 }
 0x219   :  { %455 = vadd.xlane.f32.xlu1 %v1483_v38  ;;  %v1707_v58 = vpop.xlane.xlu1 %431 }
 0x21d   :  { %461 = vadd.xlane.f32.xlu1 %v1525_v17  ;;  %v438_v17 = vpop.xlane.xlu1 %437 }
 0x26e   :  { %v691_v38 = vpop.xlane.xlu0 %690 }
 0x26f   :  { %1133 = vlog2.f32 %v691_v38 }
 0x274   :  { %v721_v60 = vpop.xlane.xlu0 %720 }
 0x275   :  { %1135 = vlog2.f32 %v721_v60 }
 0x276   :  { %v694_v0 = vpop.xlane.xlu1 %693 }
 0x277   :  { %1137 = vlog2.f32 %v694_v0 }
 0x278   :  { %v697_v15 = vpop.xlane.xlu0 %696 }
 0x279   :  { %v1134_v35 = vpop.eup %1133  ;;  %1139 = vlog2.f32 %v697_v15 }
 0x27a   :  { %v750_v4 = vmul.f32 0.6931472, %v1134_v35  ;;  %v724_v24 = vpop.xlane.xlu1 %723 }
 0x27b   :  { %1141 = vlog2.f32 %v724_v24 }
 0x27c   :  { %v789_v37 = vadd.f32 %v750_v4, %v1567_v62  ;;  %v727_v19 = vpop.xlane.xlu0 %726 }
 0x27e   :  { %v809_v25 = vsub.f32 %v789_v37, %v405_v48  ;;  %v700_v13 = vpop.xlane.xlu1 %699 }
 0x27f   :  { %v1136_v2 = vpop.eup %1135  ;;  %1143 = vlog2.f32 %v700_v13 }
 0x280   :  { %v870_v14 = vsel %vm869_vm5, %v809_v25, 0.0  ;;  %v770_v6 = vmul.f32 0.6931472, %v1136_v2  ;;  %v703_v61 = vpop.xlane.xlu0 %702 }
 0x281   :  { %v1138_v21 = vpop.eup %1137  ;;  %890 = vst [vmem:[#allocation7] sm:$0xff] %v870_v14  ;;  %1145 = vlog2.f32 %v703_v61 }
 0x282   :  { %v799_v28 = vadd.f32 %v770_v6, %v1575_v32  ;;  %v752_v10 = vmul.f32 0.6931472, %v1138_v21  ;;  %v730_v49 = vpop.xlane.xlu1 %729  ;;  %1147 = vlog2.f32 %v727_v19 }
 0x283   :  { %v1140_v62 = vpop.eup %1139 }
 0x284   :  { %v819_v55 = vsub.f32 %v799_v28, %v435_v53  ;;  %v754_v27 = vmul.f32 0.6931472, %v1140_v62  ;;  %v790_v59 = vadd.f32 %v752_v10, %v1585_v51  ;;  %v733_v29 = vpop.xlane.xlu0 %732 }
 0x285   :  { %v1142_v52 = vpop.eup %1141 }
 0x286   :  { %v880_v34 = vsel %vm869_vm5, %v819_v55, 0.0  ;;  %v791_v18 = vadd.f32 %v754_v27, %v1587_v57  ;;  %v810_v7 = vsub.f32 %v790_v59, %v408_v45  ;;  %v772_v12 = vmul.f32 0.6931472, %v1142_v52  ;;  %v706_v16 = vpop.xlane.xlu1 %705 }
 0x287   :  { %900 = vst [vmem:[#allocation7 + $0x50] sm:$0xff] %v880_v34  ;;  %1149 = vlog2.f32 %v706_v16 }
 0x288   :  { %v811_v32 = vsub.f32 %v791_v18, %v411_v50  ;;  %v871_v11 = vsel %vm869_vm5, %v810_v7, 0.0  ;;  %v800_v47 = vadd.f32 %v772_v12, %v1573_v31 }
 0x289   :  { %v709_v51 = vpop.xlane.xlu0 %708  ;;  %v1144_v48 = vpop.eup %1143  ;;  %891 = vst [vmem:[#allocation7 + $0x8] sm:$0xff] %v871_v11 }
 0x28a   :  { %1151 = vlog2.f32 %v709_v51  ;;  %v872_v53 = vsel %vm869_vm5, %v811_v32, 0.0  ;;  %v820_v38 = vsub.f32 %v800_v47, %v438_v17  ;;  %v756_v57 = vmul.f32 0.6931472, %v1144_v48  ;;  %v736_v45 = vpop.xlane.xlu1 %735 }
 0x28b   :  { %1153 = vlog2.f32 %v733_v29  ;;  %v1146_v60 = vpop.eup %1145  ;;  %892 = vst [vmem:[#allocation7 + $0x10] sm:$0xff] %v872_v53 }
 0x28c   :  { %v881_v50 = vsel %vm869_vm5, %v820_v38, 0.0  ;;  %v758_v0 = vmul.f32 0.6931472, %v1146_v60  ;;  %v792_v15 = vadd.f32 %v756_v57, %v1599_v41  ;;  %1155 = vlog2.f32 %v730_v49  ;;  %v1148_v24 = vpop.eup %1147 }
 0x28d   :  { %v739_v31 = vpop.xlane.xlu0 %738  ;;  %901 = vst [vmem:[#allocation7 + $0x58] sm:$0xff] %v881_v50  ;;  %v774_v14 = vmul.f32 0.6931472, %v1148_v24 }
 0x28e   :  { %v793_v35 = vadd.f32 %v758_v0, %v1611_v30  ;;  %v812_v4 = vsub.f32 %v792_v15, %v1697_v43  ;;  %1157 = vlog2.f32 %v739_v31  ;;  %v712_v17 = vpop.xlane.xlu1 %711 }
 0x28f   :  { %1159 = vlog2.f32 %v712_v17  ;;  %v801_v27 = vadd.f32 %v774_v14, %v1597_v36 }
 0x290   :  { %v813_v37 = vsub.f32 %v793_v35, %v1695_v33  ;;  %v873_v19 = vsel %vm869_vm5, %v812_v4, 0.0  ;;  %1161 = vlog2.f32 %v736_v45 }
 0x291   :  { %v715_v25 = vpop.xlane.xlu0 %714  ;;  %v1150_v13 = vpop.eup %1149  ;;  %893 = vst [vmem:[#allocation7 + $0x18] sm:$0xff] %v873_v19 }
 0x292   :  { %1163 = vlog2.f32 %v715_v25  ;;  %v874_v41 = vsel %vm869_vm5, %v813_v37, 0.0  ;;  %v760_v30 = vmul.f32 0.6931472, %v1150_v13  ;;  %v742_v2 = vpop.xlane.xlu1 %741 }
 0x293   :  { %894 = vst [vmem:[#allocation7 + $0x20] sm:$0xff] %v874_v41  ;;  %1165 = vlog2.f32 %v742_v2 }
 0x294   :  { %v1152_v43 = vpop.eup %1151  ;;  %v794_v33 = vadd.f32 %v760_v30, %v1623_v46 }
 0x295   :  { %v1154_v6 = vpop.eup %1153  ;;  %v762_v61 = vmul.f32 0.6931472, %v1152_v43  ;;  %v745_v21 = vpop.xlane.xlu0 %744 }
 0x296   :  { %1167 = vlog2.f32 %v745_v21  ;;  %v1156_v28 = vpop.eup %1155  ;;  %v814_v49 = vsub.f32 %v794_v33, %v1701_v44  ;;  %v718_v62 = vpop.xlane.xlu1 %717  ;;  %v778_v55 = vmul.f32 0.6931472, %v1154_v6 }
 0x297   :  { %v795_v10 = vadd.f32 %v762_v61, %v1635_v56  ;;  %1169 = vlog2.f32 %v718_v62  ;;  %v776_v18 = vmul.f32 0.6931472, %v1156_v28 }
 0x298   :  { %v1158_v59 = vpop.eup %1157  ;;  %v875_v52 = vsel %vm869_vm5, %v814_v49, 0.0  ;;  %v803_v11 = vadd.f32 %v778_v55, %v1621_v40 }
 0x299   :  { %v815_v29 = vsub.f32 %v795_v10, %v1699_v54  ;;  %v441_v46 = vpop.xlane.xlu0 %440  ;;  %v1160_v34 = vpop.eup %1159  ;;  %895 = vst [vmem:[#allocation7 + $0x28] sm:$0xff] %v875_v52  ;;  %v782_v36 = vmul.f32 0.6931472, %v1158_v59  ;;  %v802_v57 = vadd.f32 %v776_v18, %v1609_v20 }
 0x29a   :  { %v821_v7 = vsub.f32 %v801_v27, %v441_v46  ;;  %v1162_v12 = vpop.eup %1161  ;;  %v764_v44 = vmul.f32 0.6931472, %v1160_v34  ;;  %v748_v16 = vpop.xlane.xlu1 %747 }
 0x29b   :  { %v876_v56 = vsel %vm869_vm5, %v815_v29, 0.0  ;;  %1171 = vlog2.f32 %v748_v16  ;;  %v780_v53 = vmul.f32 0.6931472, %v1162_v12  ;;  %v805_v31 = vadd.f32 %v782_v36, %v1645_v1 }
 0x29c   :  { %v1164_v32 = vpop.eup %1163  ;;  %896 = vst [vmem:[#allocation7 + $0x30] sm:$0xff] %v876_v56  ;;  %v882_v54 = vsel %vm869_vm5, %v821_v7, 0.0  ;;  %v796_v51 = vadd.f32 %v764_v44, %v1647_v3 }
 0x29d   :  { %v766_v47 = vmul.f32 0.6931472, %v1164_v32  ;;  %902 = vst [vmem:[#allocation7 + $0x60] sm:$0xff] %v882_v54  ;;  %v447_v48 = vpop.xlane.xlu0 %446  ;;  %v1166_v45 = vpop.eup %1165  ;;  %v804_v19 = vadd.f32 %v780_v53, %v1633_v39 }
 0x29e   :  { %v823_v38 = vsub.f32 %v803_v11, %v447_v48  ;;  %v816_v50 = vsub.f32 %v796_v51, %v1705_v63  ;;  %v444_v0 = vpop.xlane.xlu1 %443 }
 0x29f   :  { %v797_v60 = vadd.f32 %v766_v47, %v1659_v26  ;;  %v822_v35 = vsub.f32 %v802_v57, %v444_v0  ;;  %v784_v26 = vmul.f32 0.6931472, %v1166_v45 }
 0x2a0   :  { %v1168_v15 = vpop.eup %1167  ;;  %v884_v40 = vsel %vm869_vm5, %v823_v38, 0.0  ;;  %v877_v4 = vsel %vm869_vm5, %v816_v50, 0.0 }
 0x2a1   :  { %v817_v3 = vsub.f32 %v797_v60, %v1703_v23  ;;  %v786_v17 = vmul.f32 0.6931472, %v1168_v15  ;;  %904 = vst [vmem:[#allocation7 + $0x70] sm:$0xff] %v884_v40  ;;  %v453_v20 = vpop.xlane.xlu0 %452  ;;  %v1170_v24 = vpop.eup %1169  ;;  %897 = vst [vmem:[#allocation7 + $0x38] sm:$0xff] %v877_v4  ;;  %v883_v37 = vsel %vm869_vm5, %v822_v35, 0.0  ;;  %v806_v61 = vadd.f32 %v784_v26, %v1657_v22 }
 0x2a2   :  { %v825_v63 = vsub.f32 %v805_v31, %v453_v20  ;;  %v768_v25 = vmul.f32 0.6931472, %v1170_v24  ;;  %903 = vst [vmem:[#allocation7 + $0x68] sm:$0xff] %v883_v37  ;;  %v450_v13 = vpop.xlane.xlu1 %449 }
 0x2a3   :  { %v878_v1 = vsel %vm869_vm5, %v817_v3, 0.0  ;;  %v807_v23 = vadd.f32 %v786_v17, %v1669_v8  ;;  %v824_v30 = vsub.f32 %v804_v19, %v450_v13 }
 0x2a4   :  { %898 = vst [vmem:[#allocation7 + $0x40] sm:$0xff] %v878_v1  ;;  %v886_v41 = vsel %vm869_vm5, %v825_v63, 0.0  ;;  %v798_v2 = vadd.f32 %v768_v25, %v1671_v42 }
 0x2a5   :  { %906 = vst [vmem:[#allocation7 + $0x80] sm:$0xff] %v886_v41  ;;  %v459_v43 = vpop.xlane.xlu0 %458  ;;  %v1172_v14 = vpop.eup %1171  ;;  %v885_v39 = vsel %vm869_vm5, %v824_v30, 0.0 }
 0x2a6   :  { %v827_v6 = vsub.f32 %v807_v23, %v459_v43  ;;  %v818_v33 = vsub.f32 %v798_v2, %v1707_v58  ;;  %v788_v8 = vmul.f32 0.6931472, %v1172_v14  ;;  %905 = vst [vmem:[#allocation7 + $0x78] sm:$0xff] %v885_v39  ;;  %v456_v21 = vpop.xlane.xlu1 %455 }
 0x2a7   :  { %v826_v10 = vsub.f32 %v806_v61, %v456_v21 }
 0x2a8   :  { %v888_v28 = vsel %vm869_vm5, %v827_v6, 0.0  ;;  %v879_v42 = vsel %vm869_vm5, %v818_v33, 0.0  ;;  %v808_v49 = vadd.f32 %v788_v8, %v1681_v9 }
 0x2a9   :  { %908 = vst [vmem:[#allocation7 + $0x90] sm:$0xff] %v888_v28  ;;  %899 = vst [vmem:[#allocation7 + $0x48] sm:$0xff] %v879_v42  ;;  %v887_v62 = vsel %vm869_vm5, %v826_v10, 0.0 }
 0x2aa   :  { %907 = vst [vmem:[#allocation7 + $0x88] sm:$0xff] %v887_v62  ;;  %v462_v22 = vpop.xlane.xlu1 %461 }
 0x2ab   :  { %v828_v58 = vsub.f32 %v808_v49, %v462_v22 }
 0x2ad   :  { %v889_v55 = vsel %vm869_vm5, %v828_v58, 0.0 }
 0x2ae   :  { %909 = vst [vmem:[#allocation7 + $0x98] sm:$0xff] %v889_v55 }
 0x2af   :  { %1228 = shalt.err (!%p1225_p6)
}
 0x2b0   :  { %s1229_s10 = scalar_lea.hbm %s1794_s2, 2560 }
 0x2b1   :  { %p1230_p7 = scmp.ne.s32.totalorder %s1794_s2, %s1229_s10  ;;  %p1233_p8 = scmp.lt.u32.totalorder %s1229_s10, %s1794_s2 }
 0x2b3   :  { %p1235_p9 = pnand %p1233_p8, %p1230_p7 }
 0x2b5   :  { %1238 = shalt.err (!%p1235_p9)
}
 0x2b6   :  { %921 = dma.vmem_to_hbm [thread:$0]  %s916_s6, 2560, %s1794_s2, [#allocation4], %s1246_s19, %s1246_s19, %s1247_s20  }
 0x2b7   :  { %1243 = dma.done.wait [#allocation4], 2560  }
 0x2b8   :  { %1244 = vsyncadd [#allocation4], 4294964736 }
 0x2b9   :  { %925 = vsyncpa [#allocation3], 1 }
 0x2ba   :  { %926 = vsyncpa [#allocation6], 1 }
 0x2bb   :  { %927 = vsyncpa [#allocation4], 1 }

</bundles_post_ra>
